<compile_context>
chip_gen: v7x
topology: tpu7x:2x2x1
jax: 0.10.0
libtpu: 0.0.40
codegen_flags: <defaults>
</compile_context>

<pallas_src>
import jax
import jax.numpy as jnp
from jax.experimental import pallas as pl
from jax.experimental.pallas import tpu as pltpu  # noqa: F401  (kept for TPU-specific params if needed)

# ------------------------- config (small synthetic) -------------------------
B = 2            # batch
T = 16           # mel frames
N_MELS = 8       # config.n_mels
HIDDEN = 32      # config.speaker_encoder.hidden_size
NUM_LAYERS = 2   # layers inside EncoderWithSkipConnectionLayers
LANE = 128       # TPU lane width; pad time axis to a multiple of this


def _round_up(x, m):
    return ((x + m - 1) // m) * m


# ------------------------- fused Pallas kernel -------------------------
def _fused_speaker_encoder_kernel(x_ref, m_ref, pool_ref, den_ref,
                                  wf_ref, bf_ref, wl_ref, bl_ref,
                                  wp_ref, bp_ref, wo_ref, bo_ref,
                                  out_ref):
    """Whole SpeakerEncoder forward on a lane-dense (C, B*T_pad) slab.

    x_ref:    (N_MELS, L)      input mel, batch folded into lanes, zero-padded
    m_ref:    (1, L)           sequence mask (0/1), same lane layout
    pool_ref: (L, B)           block-diagonal mask matrix for masked sum-pool
    den_ref:  (1, B)           per-batch mask.sum (pooling denominator)
    wf/bf:    (H, N_MELS), (H, 1)          fusion conv1x1
    wl/bl:    (NUM_LAYERS, H, H), (NUM_LAYERS, H, 1)  residual layers
    wp/bp:    (H, H), (H, 1)               proj conv1x1
    wo/bo:    (H, H), (H, 1)               out conv1x1
    out_ref:  (H, B)           speaker embedding (transposed in the wrapper)
    """
    x = x_ref[...]                                   # (N_MELS, L)
    m = m_ref[...]                                   # (1, L)

    # TODO(synk): modules.FusionLayer internals not provided; modeled as a
    # masked pointwise (1x1 conv) projection of the single input.
    h = (jnp.dot(wf_ref[...], x, preferred_element_type=jnp.float32)
         + bf_ref[...]) * m                          # (H, L)

    # TODO(synk): EncoderWithSkipConnectionLayers internals not provided;
    # modeled as residual masked pointwise-conv + ReLU layers.
    n_layers = wl_ref.shape[0]
    for l in range(n_layers):
        y = jnp.dot(wl_ref[l], h, preferred_element_type=jnp.float32) + bl_ref[l]
        h = (jnp.maximum(y, 0.0) + h) * m            # (H, L)

    # proj(hidden_states) * mask
    h = (jnp.dot(wp_ref[...], h, preferred_element_type=jnp.float32)
         + bp_ref[...]) * m                          # (H, L)

    # masked mean pool over time:  hidden.sum(-1) / mask.sum(-1)
    pooled_sum = jnp.dot(h, pool_ref[...],
                         preferred_element_type=jnp.float32)   # (H, B)
    pooled = pooled_sum / den_ref[...]                          # (H, B)

    # out(pooled)  (the .unsqueeze(-1)/.squeeze(-1) pair is just a 1x1 conv on
    # a single frame == plain linear layer)
    out_ref[...] = (jnp.dot(wo_ref[...], pooled,
                            preferred_element_type=jnp.float32)
                    + bo_ref[...])                              # (H, B)


def speaker_encoder_forward(params, speech, speech_lengths):
    """speech: (B, N_MELS, T) f32, speech_lengths: (B,) int32 -> (B, HIDDEN)."""
    Bx, C, Tx = speech.shape
    H = params["w_proj"].shape[0]

    # Pad time so the fused lane dimension (B * T_pad) is a multiple of 128.
    T_pad = _round_up(Tx, LANE)
    L = Bx * T_pad

    x = jnp.pad(speech.astype(jnp.float32), ((0, 0), (0, 0), (0, T_pad - Tx)))
    x2d = jnp.transpose(x, (1, 0, 2)).reshape(C, L)              # (C, B*T_pad)

    t_idx = jnp.arange(T_pad, dtype=jnp.int32)
    mask = (t_idx[None, :] < speech_lengths[:, None]).astype(jnp.float32)  # (B, T_pad)
    m2d = mask.reshape(1, L)

    # Block-diagonal mask matrix: pool[b*T_pad + t, b] = mask[b, t]
    pool = (mask[:, :, None] * jnp.eye(Bx, dtype=jnp.float32)[:, None, :]
            ).reshape(L, Bx)                                     # (L, B)
    denom = mask.sum(axis=-1)[None, :]                           # (1, B)

    out = pl.pallas_call(
        _fused_speaker_encoder_kernel,
        out_shape=jax.ShapeDtypeStruct((H, Bx), jnp.float32),
    )(x2d, m2d, pool, denom,
      params["w_fusion"], params["b_fusion"],
      params["w_layers"], params["b_layers"],
      params["w_proj"], params["b_proj"],
      params["w_out"], params["b_out"])

    return jnp.transpose(out)                                    # (B, H)


# ------------------------- pure-JAX reference (for a self-check) -------------------------
def speaker_encoder_reference(params, speech, speech_lengths):
    Bx, C, Tx = speech.shape
    mask = (jnp.arange(Tx, dtype=jnp.int32)[None, :]
            < speech_lengths[:, None]).astype(jnp.float32)[:, None, :]   # (B,1,T)

    def conv1x1(x, w, b):
        return jnp.einsum("oc,bct->bot", w, x) + b[None]

    h = conv1x1(speech, params["w_fusion"], params["b_fusion"]) * mask
    for l in range(params["w_layers"].shape[0]):
        y = jnp.maximum(conv1x1(h, params["w_layers"][l], params["b_layers"][l]), 0.0)
        h = (y + h) * mask
    h = conv1x1(h, params["w_proj"], params["b_proj"]) * mask
    pooled = h.sum(-1) / mask.sum(-1)                            # (B, H)
    sp = jnp.einsum("oc,bc->bo", params["w_out"], pooled) + params["b_out"][:, 0][None]
    return sp


# ------------------------- parameters -------------------------
def _init_conv1x1(key, cin, cout):
    kw, kb = jax.random.split(key)
    w = jax.random.normal(kw, (cout, cin), jnp.float32) / jnp.sqrt(float(cin))
    b = jax.random.normal(kb, (cout, 1), jnp.float32) * 0.01
    return w, b


def init_params(key):
    ks = jax.random.split(key, NUM_LAYERS + 3)
    wf, bf = _init_conv1x1(ks[0], N_MELS, HIDDEN)
    wl, bl = [], []
    for i in range(NUM_LAYERS):
        w, b = _init_conv1x1(ks[1 + i], HIDDEN, HIDDEN)
        wl.append(w)
        bl.append(b)
    wp, bp = _init_conv1x1(ks[1 + NUM_LAYERS], HIDDEN, HIDDEN)
    wo, bo = _init_conv1x1(ks[2 + NUM_LAYERS], HIDDEN, HIDDEN)
    return dict(
        w_fusion=wf, b_fusion=bf,
        w_layers=jnp.stack(wl), b_layers=jnp.stack(bl),
        w_proj=wp, b_proj=bp,
        w_out=wo, b_out=bo,
    )


# ------------------------- main -------------------------
if __name__ == "__main__":
    key = jax.random.PRNGKey(0)
    k_params, k_speech = jax.random.split(key)

    params = init_params(k_params)
    speech = jax.random.normal(k_speech, (B, N_MELS, T), jnp.float32)
    speech_lengths = jnp.array([16, 12], dtype=jnp.int32)

    sp_emb = speaker_encoder_forward(params, speech, speech_lengths)
    sp_ref = speaker_encoder_reference(params, speech, speech_lengths)
    jax.block_until_ready((sp_emb, sp_ref))

    assert sp_emb.shape == (B, HIDDEN)
    assert bool(jnp.allclose(sp_emb, sp_ref, atol=1e-4, rtol=1e-4)), "mismatch vs reference"
    print("KERNEL_OK")
</pallas_src>

<mosaic_0001>
module attributes {stable_mosaic.version = 11 : i64} {
  func.func @_fused_speaker_encoder_kernel(%arg0: memref<8x256xf32, #tpu.memory_space<vmem>>, %arg1: memref<1x256xf32, #tpu.memory_space<vmem>>, %arg2: memref<256x2xf32, #tpu.memory_space<vmem>>, %arg3: memref<1x2xf32, #tpu.memory_space<vmem>>, %arg4: memref<32x8xf32, #tpu.memory_space<vmem>>, %arg5: memref<32x1xf32, #tpu.memory_space<vmem>>, %arg6: memref<2x32x32xf32, #tpu.memory_space<vmem>>, %arg7: memref<2x32x1xf32, #tpu.memory_space<vmem>>, %arg8: memref<32x32xf32, #tpu.memory_space<vmem>>, %arg9: memref<32x1xf32, #tpu.memory_space<vmem>>, %arg10: memref<32x32xf32, #tpu.memory_space<vmem>>, %arg11: memref<32x1xf32, #tpu.memory_space<vmem>>, %arg12: memref<32x2xf32, #tpu.memory_space<vmem>>) attributes {dimension_semantics = [], scalar_prefetch = 0 : i64, scratch_operands = 0 : i64, tpu.core_type = #tpu.core_type<tc>} {
    %c0 = arith.constant 0 : index
    %c0_0 = arith.constant 0 : index
    %0 = vector.load %arg0[%c0, %c0_0] : memref<8x256xf32, #tpu.memory_space<vmem>>, vector<8x256xf32>
    %c0_1 = arith.constant 0 : index
    %c0_2 = arith.constant 0 : index
    %1 = vector.load %arg1[%c0_1, %c0_2] : memref<1x256xf32, #tpu.memory_space<vmem>>, vector<1x256xf32>
    %c0_3 = arith.constant 0 : index
    %c0_4 = arith.constant 0 : index
    %2 = vector.load %arg4[%c0_3, %c0_4] : memref<32x8xf32, #tpu.memory_space<vmem>>, vector<32x8xf32>
    %cst = arith.constant dense<0.000000e+00> : vector<32x256xf32>
    %3 = tpu.matmul %2, %0, %cst {dimension_numbers = #tpu.dot_dimension_numbers<[1], [0], [0], [1], [0, 0, 1, 1], [], []>} : vector<32x8xf32>, vector<8x256xf32>, vector<32x256xf32> -> vector<32x256xf32>
    %c0_5 = arith.constant 0 : index
    %c0_6 = arith.constant 0 : index
    %4 = vector.load %arg5[%c0_5, %c0_6] : memref<32x1xf32, #tpu.memory_space<vmem>>, vector<32x1xf32>
    %5 = vector.broadcast %4 : vector<32x1xf32> to vector<32x256xf32>
    %6 = arith.addf %3, %5 : vector<32x256xf32>
    %7 = vector.broadcast %1 : vector<1x256xf32> to vector<32x256xf32>
    %8 = arith.mulf %6, %7 : vector<32x256xf32>
    %c0_7 = arith.constant 0 : index
    %c0_8 = arith.constant 0 : index
    %c0_9 = arith.constant 0 : index
    %9 = vector.load %arg6[%c0_7, %c0_8, %c0_9] : memref<2x32x32xf32, #tpu.memory_space<vmem>>, vector<1x32x32xf32>
    %10 = vector.shape_cast %9 : vector<1x32x32xf32> to vector<32x32xf32>
    %cst_10 = arith.constant dense<0.000000e+00> : vector<32x256xf32>
    %11 = tpu.matmul %10, %8, %cst_10 {dimension_numbers = #tpu.dot_dimension_numbers<[1], [0], [0], [1], [0, 0, 1, 1], [], []>} : vector<32x32xf32>, vector<32x256xf32>, vector<32x256xf32> -> vector<32x256xf32>
    %c0_11 = arith.constant 0 : index
    %c0_12 = arith.constant 0 : index
    %c0_13 = arith.constant 0 : index
    %12 = vector.load %arg7[%c0_11, %c0_12, %c0_13] : memref<2x32x1xf32, #tpu.memory_space<vmem>>, vector<1x32x1xf32>
    %13 = vector.shape_cast %12 : vector<1x32x1xf32> to vector<32x1xf32>
    %14 = vector.broadcast %13 : vector<32x1xf32> to vector<32x256xf32>
    %15 = arith.addf %11, %14 : vector<32x256xf32>
    %cst_14 = arith.constant 0.000000e+00 : f32
    %16 = vector.broadcast %cst_14 : f32 to vector<32x256xf32>
    %17 = arith.maximumf %15, %16 : vector<32x256xf32>
    %18 = arith.addf %17, %8 : vector<32x256xf32>
    %19 = vector.broadcast %1 : vector<1x256xf32> to vector<32x256xf32>
    %20 = arith.mulf %18, %19 : vector<32x256xf32>
    %c1 = arith.constant 1 : index
    %c0_15 = arith.constant 0 : index
    %c0_16 = arith.constant 0 : index
    %21 = vector.load %arg6[%c1, %c0_15, %c0_16] : memref<2x32x32xf32, #tpu.memory_space<vmem>>, vector<1x32x32xf32>
    %22 = vector.shape_cast %21 : vector<1x32x32xf32> to vector<32x32xf32>
    %cst_17 = arith.constant dense<0.000000e+00> : vector<32x256xf32>
    %23 = tpu.matmul %22, %20, %cst_17 {dimension_numbers = #tpu.dot_dimension_numbers<[1], [0], [0], [1], [0, 0, 1, 1], [], []>} : vector<32x32xf32>, vector<32x256xf32>, vector<32x256xf32> -> vector<32x256xf32>
    %c1_18 = arith.constant 1 : index
    %c0_19 = arith.constant 0 : index
    %c0_20 = arith.constant 0 : index
    %24 = vector.load %arg7[%c1_18, %c0_19, %c0_20] : memref<2x32x1xf32, #tpu.memory_space<vmem>>, vector<1x32x1xf32>
    %25 = vector.shape_cast %24 : vector<1x32x1xf32> to vector<32x1xf32>
    %26 = vector.broadcast %25 : vector<32x1xf32> to vector<32x256xf32>
    %27 = arith.addf %23, %26 : vector<32x256xf32>
    %cst_21 = arith.constant 0.000000e+00 : f32
    %28 = vector.broadcast %cst_21 : f32 to vector<32x256xf32>
    %29 = arith.maximumf %27, %28 : vector<32x256xf32>
    %30 = arith.addf %29, %20 : vector<32x256xf32>
    %31 = vector.broadcast %1 : vector<1x256xf32> to vector<32x256xf32>
    %32 = arith.mulf %30, %31 : vector<32x256xf32>
    %c0_22 = arith.constant 0 : index
    %c0_23 = arith.constant 0 : index
    %33 = vector.load %arg8[%c0_22, %c0_23] : memref<32x32xf32, #tpu.memory_space<vmem>>, vector<32x32xf32>
    %cst_24 = arith.constant dense<0.000000e+00> : vector<32x256xf32>
    %34 = tpu.matmul %33, %32, %cst_24 {dimension_numbers = #tpu.dot_dimension_numbers<[1], [0], [0], [1], [0, 0, 1, 1], [], []>} : vector<32x32xf32>, vector<32x256xf32>, vector<32x256xf32> -> vector<32x256xf32>
    %c0_25 = arith.constant 0 : index
    %c0_26 = arith.constant 0 : index
    %35 = vector.load %arg9[%c0_25, %c0_26] : memref<32x1xf32, #tpu.memory_space<vmem>>, vector<32x1xf32>
    %36 = vector.broadcast %35 : vector<32x1xf32> to vector<32x256xf32>
    %37 = arith.addf %34, %36 : vector<32x256xf32>
    %38 = vector.broadcast %1 : vector<1x256xf32> to vector<32x256xf32>
    %39 = arith.mulf %37, %38 : vector<32x256xf32>
    %c0_27 = arith.constant 0 : index
    %c0_28 = arith.constant 0 : index
    %40 = vector.load %arg2[%c0_27, %c0_28] : memref<256x2xf32, #tpu.memory_space<vmem>>, vector<256x2xf32>
    %cst_29 = arith.constant dense<0.000000e+00> : vector<32x2xf32>
    %41 = tpu.matmul %39, %40, %cst_29 {dimension_numbers = #tpu.dot_dimension_numbers<[1], [0], [0], [1], [0, 0, 1, 1], [], []>} : vector<32x256xf32>, vector<256x2xf32>, vector<32x2xf32> -> vector<32x2xf32>
    %c0_30 = arith.constant 0 : index
    %c0_31 = arith.constant 0 : index
    %42 = vector.load %arg3[%c0_30, %c0_31] : memref<1x2xf32, #tpu.memory_space<vmem>>, vector<1x2xf32>
    %43 = vector.broadcast %42 : vector<1x2xf32> to vector<32x2xf32>
    %44 = arith.divf %41, %43 : vector<32x2xf32>
    %c0_32 = arith.constant 0 : index
    %c0_33 = arith.constant 0 : index
    %45 = vector.load %arg10[%c0_32, %c0_33] : memref<32x32xf32, #tpu.memory_space<vmem>>, vector<32x32xf32>
    %cst_34 = arith.constant dense<0.000000e+00> : vector<32x2xf32>
    %46 = tpu.matmul %45, %44, %cst_34 {dimension_numbers = #tpu.dot_dimension_numbers<[1], [0], [0], [1], [0, 0, 1, 1], [], []>} : vector<32x32xf32>, vector<32x2xf32>, vector<32x2xf32> -> vector<32x2xf32>
    %c0_35 = arith.constant 0 : index
    %c0_36 = arith.constant 0 : index
    %47 = vector.load %arg11[%c0_35, %c0_36] : memref<32x1xf32, #tpu.memory_space<vmem>>, vector<32x1xf32>
    %48 = vector.broadcast %47 : vector<32x1xf32> to vector<32x2xf32>
    %49 = arith.addf %46, %48 : vector<32x2xf32>
    %c0_37 = arith.constant 0 : index
    %c0_38 = arith.constant 0 : index
    %50 = vector.load %arg12[%c0_37, %c0_38] : memref<32x2xf32, #tpu.memory_space<vmem>>, vector<32x2xf32>
    tpu.vector_store %arg12[%c0_37, %c0_38], %49 {strides = array<i32>} : memref<32x2xf32, #tpu.memory_space<vmem>>, vector<32x2xf32>,
    return
  }
}

</mosaic_0001>

<bundles_post_ra>
// kernel: tpu_custom_call.1
= control target key start
LH: loop header
LB: loop body
LE: loop exit
PB: predicated region body
PF: predicated region fallthrough
CT: control target
= control target key end

     0   :  { %v1067_v2 = vmov 0.0   ;;  %vm72_vm0 = vcmask 64512   ;;  %v1068_v4 = vmov 0   ;;  %v175_v28 = vlaneseq  ;;  %s1486_s0 = inlined_call_operand.vmem [shape: f32[8,256], index: 0, kind: input, shape index: {}]   ;;  %s1487_s4 = inlined_call_operand.vmem [shape: f32[32,8], index: 4, kind: input, shape index: {}]   ;;  %s1488_s5 = inlined_call_operand.vmem [shape: f32[32,1], index: 5, kind: input, shape index: {}]   ;;  %s1489_s7 = inlined_call_operand.vmem [shape: f32[2,32,1], index: 7, kind: input, shape index: {}]   ;;  %s1490_s9 = inlined_call_operand.vmem [shape: f32[32,1], index: 9, kind: input, shape index: {}]   ;;  %s1491_s11 = inlined_call_operand.vmem [shape: f32[32,1], index: 11, kind: input, shape index: {}]   ;;  %s1492_s1 = inlined_call_operand.vmem [shape: f32[1,256], index: 1, kind: input, shape index: {}]   ;;  %s1493_s6 = inlined_call_operand.vmem [shape: f32[2,32,32], index: 6, kind: input, shape index: {}]   ;;  %s1494_s2 = inlined_call_operand.vmem [shape: f32[256,2], index: 2, kind: input, shape index: {}]   ;;  %s1495_s8 = inlined_call_operand.vmem [shape: f32[32,32], index: 8, kind: input, shape index: {}]   ;;  %s1496_s10 = inlined_call_operand.vmem [shape: f32[32,32], index: 10, kind: input, shape index: {}]   ;;  %s1497_s3 = inlined_call_operand.vmem [shape: f32[1,2], index: 3, kind: input, shape index: {}]   ;;  %s1498_s12 = inlined_call_operand.vmem [shape: f32[32,2], index: 12, kind: output, shape index: {}]  }
   0x1   :  { %v42_v0 = vld [vmem:[%s1486_s0 + $0x8] sm:$0xff]  ;;  %v41_v1 = vld [vmem:[%s1486_s0] sm:$0xff]  ;;  %149 = vmatprep.mubr.f32.mxu1 %v1067_v2  ;;  %1063 = vset.pattern.permute.xlu0 %v1068_v4  ;;  %v50_v6 = vld [vmem:[%s1488_s5 + $0x10] sm:$0xff]  ;;  %vm221_vm1 = vcmask 261120   ;;  %vm893_vm2 = vcmask 15360  }
   0x2   :  { %v44_v3 = vld [vmem:[%s1487_s4] sm:$0xff]  ;;  %85 = vmatprep.subr.mxu1 %v42_v0  ;;  %1064 = vset.pattern.permute.xlu1 %v1068_v4  ;;  %v45_v7 = vld [vmem:[%s1487_s4 + $0x8] sm:$0xff]  ;;  %v51_v9 = vld [vmem:[%s1488_s5 + $0x18] sm:$0xff]  ;;  %v176_v29 = vshrl.u32 %v175_v28, 7 }
   0x3   :  { %86 = vmatpush1.msra.mxu1 %v41_v1  ;;  %v48_v5 = vld [vmem:[%s1488_s5] sm:$0xff]  ;;  %453 = vmatprep.mubr.f32.mxu0 %v1067_v2  ;;  %v49_v8 = vld [vmem:[%s1488_s5 + $0x8] sm:$0xff]  ;;  %v46_v10 = vld [vmem:[%s1487_s4 + $0x10] sm:$0xff] }
   0x4   :  { %902 = vmatmul.mubr.msk.f32.vlgmr.msra.gmra.mrb[0].mxu1 %vm72_vm0, %v44_v3  ;;  %54 = vperm.xlu0 %1063, %v48_v5   ;;  %v197_v11 = vld [vmem:[%s1489_s7] sm:$0xff]  ;;  %v198_v12 = vld [vmem:[%s1489_s7 + $0x8] sm:$0xff]  ;;  %v47_v13 = vld [vmem:[%s1487_s4 + $0x18] sm:$0xff]  ;;  %v181_v32 = vsub.s32 1, %v176_v29  ;;  %v177_v34 = vsub.s32 0, %v176_v29 }
   0x5   :  { %155 = vmatprep.mubr.f32.mxu1 %v1067_v2  ;;  %64 = vperm.xlu1 %1064, %v50_v6   ;;  %v199_v14 = vld [vmem:[%s1489_s7 + $0x10] sm:$0xff]  ;;  %v200_v15 = vld [vmem:[%s1489_s7 + $0x18] sm:$0xff]  ;;  %v914_v16 = vld [vmem:[%s1489_s7 + $0x20] sm:$0xff] }
   0x6   :  { %v915_v17 = vld [vmem:[%s1489_s7 + $0x28] sm:$0xff]  ;;  %v916_v18 = vld [vmem:[%s1489_s7 + $0x30] sm:$0xff]  ;;  %v917_v19 = vld [vmem:[%s1489_s7 + $0x38] sm:$0xff] }
   0x7   :  { %v506_v20 = vld [vmem:[%s1490_s9] sm:$0xff]  ;;  %v507_v21 = vld [vmem:[%s1490_s9 + $0x8] sm:$0xff]  ;;  %v508_v22 = vld [vmem:[%s1490_s9 + $0x10] sm:$0xff] }
   0x8   :  { %903 = vmatmul.mubr.msk.f32.gmra.mrb[2].mxu1 %vm72_vm0, %v45_v7  ;;  %59 = vperm.xlu0 %1063, %v49_v8   ;;  %v509_v23 = vld [vmem:[%s1490_s9 + $0x18] sm:$0xff]  ;;  %v772_v24 = vld [vmem:[%s1491_s11] sm:$0xff]  ;;  %v773_v25 = vld [vmem:[%s1491_s11 + $0x8] sm:$0xff] }
   0x9   :  { %161 = vmatprep.mubr.f32.mxu1 %v1067_v2  ;;  %69 = vperm.xlu1 %1064, %v51_v9   ;;  %v774_v26 = vld [vmem:[%s1491_s11 + $0x10] sm:$0xff]  ;;  %v775_v27 = vld [vmem:[%s1491_s11 + $0x18] sm:$0xff]  ;;  %v43_v33 = vld [vmem:[%s1492_s1] sm:$0x3] }
   0xa   :  { %v1225_v38 = vrot.slane %v43_v33, %v181_v32  ;;  %v1227_v41 = vrot.slane %v43_v33, %v177_v34  ;;  %v193_v4 = vld [vmem:[%s1493_s6] sm:$0xff]  ;;  %v194_v5 = vld [vmem:[%s1493_s6 + $0x8] sm:$0xff]  ;;  %v195_v6 = vld [vmem:[%s1493_s6 + $0x10] sm:$0xff] }
   0xb   :  { %v196_v7 = vld [vmem:[%s1493_s6 + $0x18] sm:$0xff] }
   0xc   :  { %904 = vmatmul.mubr.msk.f32.gmra.mrb[4].mxu1 %vm72_vm0, %v46_v10  ;;  %203 = vperm.xlu0 %1063, %v197_v11  }
   0xd   :  { %167 = vmatprep.mubr.f32.mxu1 %v1067_v2  ;;  %208 = vperm.xlu1 %1064, %v198_v12  }
  0x10   :  { %905 = vmatmul.mubr.msk.f32.gmra.mrb[6].mxu1 %vm72_vm0, %v47_v13  ;;  %213 = vperm.xlu0 %1063, %v199_v14  }
  0x11   :  { %218 = vperm.xlu1 %1064, %v200_v15   ;;  %298 = vmatprep.mubr.f32.mxu1 %v1067_v2 }
  0x14   :  { %359 = vperm.xlu0 %1063, %v914_v16  }
  0x15   :  { %364 = vperm.xlu1 %1064, %v915_v17  }
  0x18   :  { %369 = vperm.xlu0 %1063, %v916_v18  }
  0x19   :  { %374 = vperm.xlu1 %1064, %v917_v19  }
  0x1c   :  { %512 = vperm.xlu0 %1063, %v506_v20  }
  0x1d   :  { %517 = vperm.xlu1 %1064, %v507_v21  }
  0x20   :  { %522 = vperm.xlu0 %1063, %v508_v22  }
  0x21   :  { %527 = vperm.xlu1 %1064, %v509_v23  }
  0x24   :  { %778 = vperm.xlu0 %1063, %v772_v24  }
  0x25   :  { %783 = vperm.xlu1 %1064, %v773_v25  }
  0x28   :  { %788 = vperm.xlu0 %1063, %v774_v26  }
  0x29   :  { %793 = vperm.xlu1 %1064, %v775_v27  }
  0x83   :  { %v55_v30 = vpop.permute.xlu0 %54 }
  0x84   :  { %v65_v44 = vpop.permute.xlu1 %64 }
  0x87   :  { %v60_v36 = vpop.permute.xlu0 %59 }
  0x88   :  { %v70_v54 = vpop.permute.xlu1 %69 }
  0x8b   :  { %v204_v8 = vpop.permute.xlu0 %203 }
  0x8c   :  { %v209_v13 = vpop.permute.xlu1 %208 }
  0x8f   :  { %v214_v21 = vpop.permute.xlu0 %213 }
  0x90   :  { %v219_v32 = vpop.permute.xlu1 %218 }
  0xd7   :  { %v151_v31 = vpop.f32.mrb[0].mxu1 }
  0xd8   :  { %v153_v35 = vpop.f32.mrb[1].mxu1  ;;  %v152_v40 = vadd.f32 %v151_v31, %v55_v30 }
  0xd9   :  { %v154_v37 = vadd.f32 %v153_v35, %v55_v30 }
  0xda   :  { %v185_v50 = vmul.f32 %v1227_v41, %v152_v40 }
  0xdb   :  { %v157_v39 = vpop.f32.mrb[2].mxu1  ;;  %v186_v47 = vmul.f32 %v1225_v38, %v154_v37 }
  0xdc   :  { %v158_v42 = vadd.f32 %v157_v39, %v60_v36  ;;  %v159_v43 = vpop.f32.mrb[3].mxu1 }
  0xdd   :  { %v160_v45 = vadd.f32 %v159_v43, %v60_v36 }
  0xde   :  { %v187_v46 = vmul.f32 %v1227_v41, %v158_v42 }
  0xdf   :  { %v188_v48 = vmul.f32 %v1225_v38, %v160_v45  ;;  %v163_v49 = vpop.f32.mrb[4].mxu1 }
  0xe0   :  { %v165_v51 = vpop.f32.mrb[5].mxu1  ;;  %v999_v53 = vpack.c.bf16 %v187_v46, %v185_v50  ;;  %v164_v57 = vadd.f32 %v163_v49, %v65_v44 }
  0xe1   :  { %v997_v52 = vpack.c.bf16 %v188_v48, %v186_v47  ;;  %v166_v55 = vadd.f32 %v165_v51, %v65_v44 }
  0xe2   :  { %v189_v0 = vmul.f32 %v1227_v41, %v164_v57 }
  0xe3   :  { %v169_v56 = vpop.f32.mrb[6].mxu1  ;;  %998 = vmatprep.subr.bf16.mxu1 %v997_v52  ;;  %v190_v62 = vmul.f32 %v1225_v38, %v166_v55 }
  0xe4   :  { %v170_v58 = vadd.f32 %v169_v56, %v70_v54  ;;  %v171_v59 = vpop.f32.mrb[7].mxu1  ;;  %1000 = vmatpush1.bf16.msra.mxu1 %v999_v53 }
  0xe5   :  { %v172_v60 = vadd.f32 %v171_v59, %v70_v54  ;;  %v911_v59 = vld [vmem:[%s1493_s6 + $0x28] sm:$0xff] }
  0xe6   :  { %v1234_v61 = vmul.f32 %v1227_v41, %v170_v58  ;;  %v910_v58 = vld [vmem:[%s1493_s6 + $0x20] sm:$0xff] }
  0xe7   :  { %v1238_v63 = vmul.f32 %v1225_v38, %v172_v60  ;;  %v912_v60 = vld [vmem:[%s1493_s6 + $0x30] sm:$0xff] }
  0xe8   :  { %v1003_v3 = vpack.c.bf16 %v1234_v61, %v189_v0 }
  0xe9   :  { %v1001_v1 = vpack.c.bf16 %v1238_v63, %v190_v62 }
  0xeb   :  { %1002 = vmatprep.subr.bf16.mxu1 %v1001_v1 }
  0xec   :  { %1004 = vmatpush1.bf16.msra.mxu1 %v1003_v3  ;;  %v640_v3 = vld [vmem:[%s1494_s2 + $0x8] sm:$0xff] }
  0xef   :  { %906 = vmatmul.mubr.msk.f32.vlgmr.msra.gmra.mrb[8].mxu1 %vm221_vm1, %v193_v4  ;;  %v657_v4 = vld [vmem:[%s1494_s2 + $0x90] sm:$0xff] }
  0xf0   :  { %304 = vmatprep.mubr.f32.mxu1 %v1067_v2 }
  0xf3   :  { %907 = vmatmul.mubr.msk.f32.gmra.mrb[10].mxu1 %vm221_vm1, %v194_v5  ;;  %v658_v5 = vld [vmem:[%s1494_s2 + $0x98] sm:$0xff] }
  0xf4   :  { %310 = vmatprep.mubr.f32.mxu1 %v1067_v2 }
  0xf7   :  { %908 = vmatmul.mubr.msk.f32.gmra.mrb[12].mxu1 %vm221_vm1, %v195_v6 }
  0xf8   :  { %316 = vmatprep.mubr.f32.mxu1 %v1067_v2 }
  0xfb   :  { %909 = vmatmul.mubr.msk.f32.gmra.mrb[14].mxu1 %vm221_vm1, %v196_v7  ;;  %v1025_v7 = vpack.c.bf16 %v658_v5, %v657_v4 }
  0xfc   :  { %606 = vmatprep.mubr.f32.mxu1 %v1067_v2 }
 0x1c2   :  { %v300_v9 = vpop.f32.mrb[8].mxu1 }
 0x1c3   :  { %v301_v10 = vadd.f32 %v300_v9, %v204_v8  ;;  %v302_v11 = vpop.f32.mrb[9].mxu1  ;;  %v642_v9 = vld [vmem:[%s1494_s2 + $0x18] sm:$0xff] }
 0x1c4   :  { %v303_v12 = vadd.f32 %v302_v11, %v204_v8  ;;  %v641_v8 = vld [vmem:[%s1494_s2 + $0x10] sm:$0xff]  ;;  %v660_v11 = vld [vmem:[%s1494_s2 + $0xa8] sm:$0xff] }
 0x1c5   :  { %v323_v16 = vmax.f32 %v301_v10, 0.0  ;;  %v659_v10 = vld [vmem:[%s1494_s2 + $0xa0] sm:$0xff] }
 0x1c6   :  { %v324_v14 = vmax.f32 %v303_v12, 0.0  ;;  %v306_v15 = vpop.f32.mrb[10].mxu1  ;;  %v1027_v12 = vpack.c.bf16 %v642_v9, %v641_v8 }
 0x1c7   :  { %v307_v17 = vadd.f32 %v306_v15, %v209_v13  ;;  %v308_v18 = vpop.f32.mrb[11].mxu1  ;;  %v331_v25 = vadd.f32 %v323_v16, %v185_v50  ;;  %v644_v15 = vld [vmem:[%s1494_s2 + $0x28] sm:$0xff]  ;;  %v661_v16 = vld [vmem:[%s1494_s2 + $0xb0] sm:$0xff] }
 0x1c8   :  { %v309_v19 = vadd.f32 %v308_v18, %v209_v13  ;;  %v332_v22 = vadd.f32 %v324_v14, %v186_v47  ;;  %v1029_v13 = vpack.c.bf16 %v660_v11, %v659_v10  ;;  %v643_v14 = vld [vmem:[%s1494_s2 + $0x20] sm:$0xff] }
 0x1c9   :  { %v325_v20 = vmax.f32 %v307_v17, 0.0  ;;  %v1273_v42 = vmul.f32 %v331_v25, %v1227_v41  ;;  %v662_v17 = vld [vmem:[%s1494_s2 + $0xb8] sm:$0xff]  ;;  %v1031_v18 = vpack.c.bf16 %v644_v15, %v643_v14 }
 0x1ca   :  { %v326_v23 = vmax.f32 %v309_v19, 0.0  ;;  %v312_v24 = vpop.f32.mrb[12].mxu1  ;;  %v1267_v35 = vmul.f32 %v332_v22, %v1225_v38  ;;  %v1033_v19 = vpack.c.bf16 %v662_v17, %v661_v16  ;;  %v663_v22 = vld [vmem:[%s1494_s2 + $0xc0] sm:$0xff] }
 0x1cb   :  { %v333_v26 = vadd.f32 %v325_v20, %v187_v46  ;;  %v313_v27 = vadd.f32 %v312_v24, %v214_v21  ;;  %v314_v28 = vpop.f32.mrb[13].mxu1  ;;  %v645_v20 = vld [vmem:[%s1494_s2 + $0x30] sm:$0xff] }
 0x1cc   :  { %v334_v29 = vadd.f32 %v326_v23, %v188_v48  ;;  %v315_v30 = vadd.f32 %v314_v28, %v214_v21  ;;  %v646_v21 = vld [vmem:[%s1494_s2 + $0x38] sm:$0xff]  ;;  %v664_v23 = vld [vmem:[%s1494_s2 + $0xc8] sm:$0xff]  ;;  %v665_v28 = vld [vmem:[%s1494_s2 + $0xd0] sm:$0xff] }
 0x1cd   :  { %v1264_v31 = vmul.f32 %v333_v26, %v1227_v41  ;;  %v327_v37 = vmax.f32 %v313_v27, 0.0  ;;  %v1035_v24 = vpack.c.bf16 %v646_v21, %v645_v20  ;;  %v1037_v25 = vpack.c.bf16 %v664_v23, %v663_v22  ;;  %v647_v26 = vld [vmem:[%s1494_s2 + $0x40] sm:$0xff]  ;;  %v648_v27 = vld [vmem:[%s1494_s2 + $0x48] sm:$0xff] }
 0x1ce   :  { %v328_v33 = vmax.f32 %v315_v30, 0.0  ;;  %v318_v34 = vpop.f32.mrb[14].mxu1  ;;  %v1270_v36 = vmul.f32 %v334_v29, %v1225_v38  ;;  %v666_v29 = vld [vmem:[%s1494_s2 + $0xd8] sm:$0xff]  ;;  %v1039_v30 = vpack.c.bf16 %v648_v27, %v647_v26 }
 0x1cf   :  { %v319_v39 = vadd.f32 %v318_v34, %v219_v32  ;;  %v320_v40 = vpop.f32.mrb[15].mxu1  ;;  %v1007_v46 = vpack.c.bf16 %v1264_v31, %v1273_v42  ;;  %v335_v49 = vadd.f32 %v327_v37, %v189_v0  ;;  %v639_v0 = vld [vmem:[%s1494_s2] sm:$0xff]  ;;  %v650_v34 = vld [vmem:[%s1494_s2 + $0x58] sm:$0xff] }
 0x1d0   :  { %v321_v43 = vadd.f32 %v320_v40, %v219_v32  ;;  %v1005_v44 = vpack.c.bf16 %v1270_v36, %v1267_v35  ;;  %v336_v47 = vadd.f32 %v328_v33, %v190_v62  ;;  %v655_v62 = vld [vmem:[%s1494_s2 + $0x80] sm:$0xff]  ;;  %v1023_v6 = vpack.c.bf16 %v640_v3, %v639_v0  ;;  %v649_v33 = vld [vmem:[%s1494_s2 + $0x50] sm:$0xff] }
 0x1d1   :  { %v329_v45 = vmax.f32 %v319_v39, 0.0  ;;  %v1291_v55 = vmul.f32 %v335_v49, %v1227_v41  ;;  %v1041_v32 = vpack.c.bf16 %v666_v29, %v665_v28  ;;  %v667_v37 = vld [vmem:[%s1494_s2 + $0xe0] sm:$0xff]  ;;  %v668_v39 = vld [vmem:[%s1494_s2 + $0xe8] sm:$0xff]  ;;  %v1043_v40 = vpack.c.bf16 %v650_v34, %v649_v33  ;;  %v505_v28 = vld [vmem:[%s1495_s8 + $0x18] sm:$0xff] }
 0x1d2   :  { %v330_v48 = vmax.f32 %v321_v43, 0.0  ;;  %1006 = vmatprep.subr.bf16.mxu0 %v1005_v44  ;;  %v1285_v53 = vmul.f32 %v336_v47, %v1225_v38  ;;  %v1045_v43 = vpack.c.bf16 %v668_v39, %v667_v37  ;;  %v360_v44 = vpop.permute.xlu0 %359  ;;  %v651_v29 = vld [vmem:[%s1494_s2 + $0x60] sm:$0xff]  ;;  %v670_v33 = vld [vmem:[%s1494_s2 + $0xf8] sm:$0xff]  ;;  %v653_v37 = vld [vmem:[%s1494_s2 + $0x70] sm:$0xff] }
 0x1d3   :  { %v337_v50 = vadd.f32 %v329_v45, %v1234_v61  ;;  %1008 = vmatpush1.bf16.msra.mxu0 %v1007_v46  ;;  %v913_v61 = vld [vmem:[%s1493_s6 + $0x38] sm:$0xff] }
 0x1d4   :  { %v338_v51 = vadd.f32 %v330_v48, %v1238_v63  ;;  %v656_v63 = vld [vmem:[%s1494_s2 + $0x88] sm:$0xff]  ;;  %v654_v39 = vld [vmem:[%s1494_s2 + $0x78] sm:$0xff] }
 0x1d5   :  { %v1282_v52 = vmul.f32 %v337_v50, %v1227_v41  ;;  %v1021_v1 = vpack.c.bf16 %v656_v63, %v655_v62  ;;  %v365_v50 = vpop.permute.xlu1 %364 }
 0x1d6   :  { %v1288_v54 = vmul.f32 %v338_v51, %v1225_v38  ;;  %v370_v62 = vpop.permute.xlu0 %369 }
 0x1d7   :  { %v1011_v57 = vpack.c.bf16 %v1282_v52, %v1291_v55 }
 0x1d8   :  { %v1009_v56 = vpack.c.bf16 %v1288_v54, %v1285_v53 }
 0x1d9   :  { %v375_v11 = vpop.permute.xlu1 %374 }
 0x1da   :  { %1010 = vmatprep.subr.bf16.mxu0 %v1009_v56 }
 0x1db   :  { %1012 = vmatpush1.bf16.msra.mxu0 %v1011_v57 }
 0x1dc   :  { %1022 = vmatprep.subr.bf16.mxu0 %v1021_v1 }
 0x1de   :  { %918 = vmatmul.mubr.msk.f32.vlgmr.msra.gmra.mrb[0].mxu0 %vm221_vm1, %v910_v58 }
 0x1df   :  { %459 = vmatprep.mubr.f32.mxu0 %v1067_v2  ;;  %1024 = vmatpush3.bf16.msra.mxu0 %v1023_v6 }
 0x1e0   :  { %1026 = vmatprep.subr.bf16.mxu0 %v1025_v7 }
 0x1e2   :  { %919 = vmatmul.mubr.msk.f32.gmra.mrb[2].mxu0 %vm221_vm1, %v911_v59 }
 0x1e3   :  { %465 = vmatprep.mubr.f32.mxu0 %v1067_v2  ;;  %1028 = vmatpush3.bf16.msra.mxu0 %v1027_v12 }
 0x1e4   :  { %1030 = vmatprep.subr.bf16.mxu0 %v1029_v13 }
 0x1e6   :  { %920 = vmatmul.mubr.msk.f32.gmra.mrb[4].mxu0 %vm221_vm1, %v912_v60 }
 0x1e7   :  { %471 = vmatprep.mubr.f32.mxu0 %v1067_v2  ;;  %1032 = vmatpush3.bf16.msra.mxu0 %v1031_v18 }
 0x1e8   :  { %1034 = vmatprep.subr.bf16.mxu0 %v1033_v19 }
 0x1ea   :  { %921 = vmatmul.mubr.msk.f32.gmra.mrb[6].mxu0 %vm221_vm1, %v913_v61 }
 0x1eb   :  { %1036 = vmatpush3.bf16.msra.mxu0 %v1035_v24 }
 0x1ec   :  { %1038 = vmatprep.subr.bf16.mxu0 %v1037_v25 }
 0x1ef   :  { %1040 = vmatpush3.bf16.msra.mxu0 %v1039_v30  ;;  %v652_v30 = vld [vmem:[%s1494_s2 + $0x68] sm:$0xff] }
 0x1f0   :  { %1042 = vmatprep.subr.bf16.mxu0 %v1041_v32  ;;  %v1047_v32 = vpack.c.bf16 %v652_v30, %v651_v29 }
 0x1f3   :  { %1044 = vmatpush3.bf16.msra.mxu0 %v1043_v40  ;;  %v1051_v40 = vpack.c.bf16 %v654_v39, %v653_v37 }
 0x1f4   :  { %1046 = vmatprep.subr.bf16.mxu0 %v1045_v43  ;;  %v513_v43 = vpop.permute.xlu0 %512 }
 0x1f7   :  { %1048 = vmatpush3.bf16.msra.mxu0 %v1047_v32 }
 0x2b1   :  { %v455_v45 = vpop.f32.mrb[0].mxu0 }
 0x2b2   :  { %v456_v46 = vadd.f32 %v455_v45, %v360_v44  ;;  %v457_v47 = vpop.f32.mrb[1].mxu0 }
 0x2b3   :  { %v458_v48 = vadd.f32 %v457_v47, %v360_v44 }
 0x2b4   :  { %v478_v49 = vmax.f32 %v456_v46, 0.0 }
 0x2b5   :  { %v479_v51 = vmax.f32 %v458_v48, 0.0  ;;  %v461_v56 = vpop.f32.mrb[2].mxu0  ;;  %v518_v48 = vpop.permute.xlu1 %517 }
 0x2b6   :  { %v462_v57 = vadd.f32 %v461_v56, %v365_v50  ;;  %v463_v58 = vpop.f32.mrb[3].mxu0  ;;  %v486_v60 = vadd.f32 %v478_v49, %v1273_v42 }
 0x2b7   :  { %v464_v59 = vadd.f32 %v463_v58, %v365_v50  ;;  %v487_v63 = vadd.f32 %v479_v51, %v1267_v35 }
 0x2b8   :  { %v480_v61 = vmax.f32 %v462_v57, 0.0  ;;  %v494_v8 = vmul.f32 %v486_v60, %v1227_v41 }
 0x2b9   :  { %v481_v0 = vmax.f32 %v464_v59, 0.0  ;;  %v467_v1 = vpop.f32.mrb[4].mxu0  ;;  %v495_v42 = vmul.f32 %v487_v63, %v1225_v38  ;;  %v523_v59 = vpop.permute.xlu0 %522 }
 0x2ba   :  { %v488_v3 = vadd.f32 %v480_v61, %v1264_v31  ;;  %v468_v4 = vadd.f32 %v467_v1, %v370_v62  ;;  %v469_v5 = vpop.f32.mrb[5].mxu0 }
 0x2bb   :  { %v489_v6 = vadd.f32 %v481_v0, %v1270_v36  ;;  %v470_v7 = vadd.f32 %v469_v5, %v370_v62 }
 0x2bc   :  { %v496_v9 = vmul.f32 %v488_v3, %v1227_v41  ;;  %v482_v10 = vmax.f32 %v468_v4, 0.0  ;;  %v528_v3 = vpop.permute.xlu1 %527 }
 0x2bd   :  { %v497_v12 = vmul.f32 %v489_v6, %v1225_v38  ;;  %v483_v35 = vmax.f32 %v470_v7, 0.0  ;;  %v473_v13 = vpop.f32.mrb[6].mxu0 }
 0x2be   :  { %v1015_v14 = vpack.c.bf16 %v496_v9, %v494_v8  ;;  %v474_v15 = vadd.f32 %v473_v13, %v375_v11  ;;  %v475_v31 = vpop.f32.mrb[7].mxu0  ;;  %v490_v36 = vadd.f32 %v482_v10, %v1291_v55 }
 0x2bf   :  { %v476_v16 = vadd.f32 %v475_v31, %v375_v11  ;;  %v1013_v17 = vpack.c.bf16 %v497_v12, %v495_v42  ;;  %v491_v19 = vadd.f32 %v483_v35, %v1285_v53  ;;  %v502_v53 = vld [vmem:[%s1495_s8] sm:$0xff] }
 0x2c0   :  { %v484_v18 = vmax.f32 %v474_v15, 0.0  ;;  %v498_v23 = vmul.f32 %v490_v36, %v1227_v41  ;;  %v768_v42 = vld [vmem:[%s1496_s10] sm:$0xff] }
 0x2c1   :  { %v485_v20 = vmax.f32 %v476_v16, 0.0  ;;  %1014 = vmatprep.subr.bf16.mxu1 %v1013_v17  ;;  %v499_v25 = vmul.f32 %v491_v19, %v1225_v38  ;;  %v926_v12 = vld [vmem:[%s1497_s3] ss:$0 sm:$0xff] }
 0x2c2   :  { %v492_v21 = vadd.f32 %v484_v18, %v1282_v52  ;;  %1016 = vmatpush1.bf16.msra.mxu1 %v1015_v14  ;;  %v503_v52 = vld [vmem:[%s1495_s8 + $0x8] sm:$0xff]  ;;  %1065 = vrcp.f32 %v926_v12 }
 0x2c3   :  { %v493_v22 = vadd.f32 %v485_v20, %v1288_v54  ;;  %v504_v54 = vld [vmem:[%s1495_s8 + $0x10] sm:$0xff] }
 0x2c4   :  { %v500_v24 = vmul.f32 %v492_v21, %v1227_v41 }
 0x2c5   :  { %v501_v26 = vmul.f32 %v493_v22, %v1225_v38 }
 0x2c6   :  { %v1019_v27 = vpack.c.bf16 %v500_v24, %v498_v23 }
 0x2c7   :  { %v1017_v55 = vpack.c.bf16 %v501_v26, %v499_v25 }
 0x2c9   :  { %1018 = vmatprep.subr.bf16.mxu1 %v1017_v55  ;;  %v770_v55 = vld [vmem:[%s1496_s10 + $0x10] sm:$0xff] }
 0x2ca   :  { %1020 = vmatpush1.bf16.msra.mxu1 %v1019_v27  ;;  %v769_v27 = vld [vmem:[%s1496_s10 + $0x8] sm:$0xff] }
 0x2cd   :  { %922 = vmatmul.mubr.msk.f32.vlgmr.msra.gmra.mrb[16].mxu1 %vm221_vm1, %v502_v53  ;;  %v771_v53 = vld [vmem:[%s1496_s10 + $0x18] sm:$0xff] }
 0x2ce   :  { %612 = vmatprep.mubr.f32.mxu1 %v1067_v2 }
 0x2d1   :  { %923 = vmatmul.mubr.msk.f32.gmra.mrb[18].mxu1 %vm221_vm1, %v503_v52  ;;  %v784_v52 = vpop.permute.xlu1 %783 }
 0x2d2   :  { %618 = vmatprep.mubr.f32.mxu1 %v1067_v2 }
 0x2d5   :  { %924 = vmatmul.mubr.msk.f32.gmra.mrb[20].mxu1 %vm221_vm1, %v504_v54  ;;  %v779_v54 = vpop.permute.xlu0 %778 }
 0x2d6   :  { %624 = vmatprep.mubr.f32.mxu1 %v1067_v2  ;;  %v669_v2 = vld [vmem:[%s1494_s2 + $0xf0] sm:$0xff] }
 0x2d7   :  { %v1049_v34 = vpack.c.bf16 %v670_v33, %v669_v2  ;;  %v794_v2 = vpop.permute.xlu1 %793 }
 0x2d9   :  { %925 = vmatmul.mubr.msk.f32.gmra.mrb[22].mxu1 %vm221_vm1, %v505_v28  ;;  %1050 = vmatprep.subr.bf16.mxu0 %v1049_v34  ;;  %v789_v34 = vpop.permute.xlu0 %788 }
 0x2da   :  { %1052 = vmatpush3.bf16.msra.mxu0 %v1051_v40  ;;  %991 = vmatprep.mubr.msk.f32.mxu1 %vm221_vm1, %v768_v42 }
 0x3a0   :  { %v608_v44 = vpop.f32.mrb[16].mxu1 }
 0x3a1   :  { %v609_v45 = vadd.f32 %v608_v44, %v513_v43  ;;  %v610_v46 = vpop.f32.mrb[17].mxu1 }
 0x3a2   :  { %v611_v47 = vadd.f32 %v610_v46, %v513_v43 }
 0x3a3   :  { %v631_v51 = vmul.f32 %v609_v45, %v1227_v41 }
 0x3a4   :  { %v632_v49 = vmul.f32 %v611_v47, %v1225_v38  ;;  %v614_v50 = vpop.f32.mrb[18].mxu1 }
 0x3a5   :  { %v615_v56 = vadd.f32 %v614_v50, %v518_v48  ;;  %v616_v57 = vpop.f32.mrb[19].mxu1 }
 0x3a6   :  { %v617_v58 = vadd.f32 %v616_v57, %v518_v48  ;;  %735 = vmatprep.mubr.f32.mxu0 %v632_v49 }
 0x3a7   :  { %736 = vmatmul.mubr.f32.vlgmr.msra.gmra.mrb[8].mxu0 %v631_v51  ;;  %v633_v62 = vmul.f32 %v615_v56, %v1227_v41 }
 0x3a8   :  { %v634_v60 = vmul.f32 %v617_v58, %v1225_v38  ;;  %v620_v61 = vpop.f32.mrb[20].mxu1 }
 0x3a9   :  { %v621_v63 = vadd.f32 %v620_v61, %v523_v59  ;;  %v622_v0 = vpop.f32.mrb[21].mxu1 }
 0x3aa   :  { %v623_v1 = vadd.f32 %v622_v0, %v523_v59  ;;  %740 = vmatprep.mubr.f32.mxu0 %v634_v60 }
 0x3ab   :  { %741 = vmatmul.mubr.f32.gmra.mrb[10].mxu0 %v633_v62  ;;  %v635_v6 = vmul.f32 %v621_v63, %v1227_v41 }
 0x3ac   :  { %v636_v4 = vmul.f32 %v623_v1, %v1225_v38  ;;  %v626_v5 = vpop.f32.mrb[22].mxu1 }
 0x3ad   :  { %v627_v7 = vadd.f32 %v626_v5, %v528_v3  ;;  %v628_v8 = vpop.f32.mrb[23].mxu1 }
 0x3ae   :  { %v629_v9 = vadd.f32 %v628_v8, %v528_v3  ;;  %745 = vmatprep.mubr.f32.mxu0 %v636_v4 }
 0x3af   :  { %746 = vmatmul.mubr.f32.gmra.mrb[12].mxu0 %v635_v6  ;;  %v637_v11 = vmul.f32 %v627_v7, %v1227_v41 }
 0x3b0   :  { %v638_v10 = vmul.f32 %v629_v9, %v1225_v38  ;;  %v1066_v38 = vpop.eup %1065 }
 0x3b2   :  { %750 = vmatprep.mubr.f32.mxu0 %v638_v10 }
 0x3b3   :  { %751 = vmatmul.mubr.f32.gmra.mrb[14].mxu0 %v637_v11 }
 0x47a   :  { %v963_v35 = vpop.f32.mrb[8].mxu0 }
 0x47b   :  { %v964_v13 = vpop.f32.mrb[9].mxu0 }
 0x47c   :  { %v965_v14 = vadd.f32 %v964_v13, %v963_v35 }
 0x47e   :  { %v966_v15 = vpop.f32.mrb[10].mxu0  ;;  %v764_v16 = vmul.f32 %v1066_v38, %v965_v14 }
 0x47f   :  { %v967_v31 = vpop.f32.mrb[11].mxu0 }
 0x480   :  { %v968_v41 = vadd.f32 %v967_v31, %v966_v15 }
 0x482   :  { %v765_v17 = vmul.f32 %v1066_v38, %v968_v41  ;;  %v969_v36 = vpop.f32.mrb[12].mxu0 }
 0x483   :  { %v970_v18 = vpop.f32.mrb[13].mxu0 }
 0x484   :  { %v971_v19 = vadd.f32 %v970_v18, %v969_v36  ;;  %v1053_v20 = vpack.c.bf16 %v765_v17, %v764_v16 }
 0x486   :  { %v972_v21 = vpop.f32.mrb[14].mxu0  ;;  %1054 = vmatprep.subr.bf16.mxu1 %v1053_v20  ;;  %v766_v24 = vmul.f32 %v1066_v38, %v971_v19 }
 0x487   :  { %v973_v22 = vpop.f32.mrb[15].mxu0  ;;  %1056 = vmatpush3.bf16.msra.mxu1 %v1053_v20 }
 0x488   :  { %v974_v23 = vadd.f32 %v973_v22, %v972_v21 }
 0x48a   :  { %v767_v25 = vmul.f32 %v1066_v38, %v974_v23 }
 0x48c   :  { %v1057_v26 = vpack.c.bf16 %v767_v25, %v766_v24 }
 0x48e   :  { %1058 = vmatprep.subr.bf16.mxu1 %v1057_v26 }
 0x48f   :  { %1060 = vmatpush3.bf16.msra.mxu1 %v1057_v26 }
 0x492   :  { %992 = vmatmul.mubr.msk.f32.vlgmr.msra.gmra.mrb[24].mxu1 %vm221_vm1, %v769_v27 }
 0x493   :  { %994 = vmatprep.mubr.msk.f32.mxu1 %vm221_vm1, %v770_v55 }
 0x496   :  { %995 = vmatmul.mubr.msk.f32.gmra.mrb[26].mxu1 %vm221_vm1, %v771_v53 }
 0x565   :  { %v993_v28 = vpop.f32.mrb[24].mxu1 }
 0x566   :  { %v880_v29 = vadd.f32 %v993_v28, %v784_v52  ;;  %v874_v30 = vpop.f32.mrb[25].mxu1 }
 0x567   :  { %v875_v32 = vadd.f32 %v874_v30, %v779_v54 }
 0x568   :  { %895 = vst.msk [vmem:[%s1498_s12 + $0x8] sm:$0xff] %vm893_vm2, %v880_v29 }
 0x569   :  { %894 = vst.msk [vmem:[%s1498_s12] sm:$0xff] %vm893_vm2, %v875_v32  ;;  %v996_v33 = vpop.f32.mrb[26].mxu1 }
 0x56a   :  { %v890_v37 = vadd.f32 %v996_v33, %v794_v2  ;;  %v884_v39 = vpop.f32.mrb[27].mxu1 }
 0x56b   :  { %v885_v40 = vadd.f32 %v884_v39, %v789_v34 }
 0x56c   :  { %897 = vst.msk [vmem:[%s1498_s12 + $0x18] sm:$0xff] %vm893_vm2, %v890_v37 }
 0x56d   :  { %896 = vst.msk [vmem:[%s1498_s12 + $0x10] sm:$0xff] %vm893_vm2, %v885_v40 }

</bundles_post_ra>
